<compile_context>
chip_gen: v7x
topology: tpu7x:2x2x1
jax: 0.10.0
libtpu: 0.0.40
codegen_flags: <defaults>
</compile_context>

<pallas_src>
import jax
import jax.numpy as jnp
from jax.experimental import pallas as pl
from jax.experimental.pallas import tpu as pltpu


def channel_gate_kernel(x_ref, w1_ref, b1_ref, w2_ref, b2x2_ref, o_ref):
    # x_ref: (Bt, C, HW) block, native dtype.
    x = x_ref[...]                                          # no full-block upcast
    bt = x_ref.shape[0]
    inv_hw = jnp.float32(1.0 / x_ref.shape[-1])             # compile-time constant

    # Global spatial pooling over the lane axis; sum accumulates in f32.
    s = jnp.sum(x, axis=-1, dtype=jnp.float32)               # (Bt, C)
    mx = jnp.max(x, axis=-1).astype(jnp.float32)             # (Bt, C)
    avg = s * inv_hw                                          # mean via 1/HW mul

    # One MLP pass over the stacked [avg; max] statistics.
    pooled = jnp.concatenate([avg, mx], axis=0)               # (2*Bt, C)

    w1 = w1_ref[...]                                          # (C, Hp)  padded hidden
    b1 = b1_ref[...]                                          # (1, Hp)
    w2 = w2_ref[...]                                          # (Hp, C)
    b2x2 = b2x2_ref[...]                                      # (1, C) == 2 * b2

    h = jnp.dot(pooled, w1, preferred_element_type=jnp.float32) + b1
    h = jnp.maximum(h, 0.0)                                   # ReLU
    att2 = jnp.dot(h, w2, preferred_element_type=jnp.float32)  # (2*Bt, C)

    # mlp(avg) + mlp(max): the reference adds b2 inside each MLP call, so the
    # summed attention carries 2*b2 — added once here on the (Bt, C) tensor.
    att = att2[:bt] + att2[bt:] + b2x2                        # (Bt, C)
    scale = jax.nn.sigmoid(att).astype(x.dtype)               # (Bt, C)

    o_ref[...] = x * scale[:, :, None]                        # native-dtype store


def _pick_bt(B, C, HW, itemsize, vmem_budget=8 * 1024 * 1024, min_grid=2):
    """Largest Bt dividing B whose per-step footprint (in+out, double-buffered)
    fits the budget while keeping >= min_grid grid steps (feeds both v7x TCs)."""
    best = 1
    for bt in range(1, B + 1):
        if B % bt:
            continue
        footprint = 4 * bt * C * HW * itemsize   # 2 input bufs + 2 output bufs
        if footprint > vmem_budget:
            break
        if B < min_grid or B // bt >= min_grid:
            best = bt
    return best


def channel_gate(x, w1, b1, w2, b2):
    """x: (B, C, H, W).  w1: (hidden, C), b1: (hidden,), w2: (C, hidden), b2: (C,)."""
    B, C, H, W = x.shape
    HW = H * W
    hidden = w1.shape[0]
    Hp = ((hidden + 7) // 8) * 8                 # pad hidden to sublane multiple

    x3 = x.reshape(B, C, HW)
    Bt = _pick_bt(B, C, HW, x3.dtype.itemsize)
    grid = (B // Bt,)

    # Zero-padded, pre-transposed weights (padding is exact: ReLU(0)=0 and the
    # padded rows of w2 are zero, so the extra hidden units contribute nothing).
    w1t = jnp.zeros((C, Hp), jnp.float32).at[:, :hidden].set(
        jnp.asarray(w1, jnp.float32).T)
    b1r = jnp.zeros((1, Hp), jnp.float32).at[:, :hidden].set(
        jnp.asarray(b1, jnp.float32))
    w2t = jnp.zeros((Hp, C), jnp.float32).at[:hidden, :].set(
        jnp.asarray(w2, jnp.float32).T)
    b2x2 = (2.0 * jnp.asarray(b2, jnp.float32)).reshape(1, C)

    out = pl.pallas_call(
        channel_gate_kernel,
        out_shape=jax.ShapeDtypeStruct((B, C, HW), x.dtype),
        grid_spec=pltpu.PrefetchScalarGridSpec(
            num_scalar_prefetch=0,
            grid=grid,
            in_specs=[
                pl.BlockSpec((Bt, C, HW), lambda b: (b, 0, 0)),   # x tile
                pl.BlockSpec((C, Hp), lambda b: (0, 0)),          # W1^T (padded)
                pl.BlockSpec((1, Hp), lambda b: (0, 0)),          # b1  (padded)
                pl.BlockSpec((Hp, C), lambda b: (0, 0)),          # W2^T (padded)
                pl.BlockSpec((1, C), lambda b: (0, 0)),           # 2*b2
            ],
            out_specs=pl.BlockSpec((Bt, C, HW), lambda b: (b, 0, 0)),
        ),
        compiler_params=pltpu.CompilerParams(
            dimension_semantics=("parallel",)),
    )(x3, w1t, b1r, w2t, b2x2)
    return out.reshape(B, C, H, W)


def channel_gate_ref(x, w1, b1, w2, b2):
    """Pure-JAX reference matching the PyTorch forward."""
    avg = jnp.mean(x, axis=(2, 3))                  # (B, C)
    mx = jnp.max(x, axis=(2, 3))                    # (B, C)

    def mlp(p):
        h = jnp.maximum(p @ w1.T + b1, 0.0)
        return h @ w2.T + b2

    att = mlp(avg) + mlp(mx)
    scale = jax.nn.sigmoid(att)[:, :, None, None]
    return x * scale


if __name__ == "__main__":
    # Module config: gate_channels=32, reduction_ratio=16 -> hidden=2
    B, C, H, W = 2, 32, 16, 16
    reduction_ratio = 16
    hidden = C // reduction_ratio

    key = jax.random.PRNGKey(0)
    kx, k1, k2, k3, k4 = jax.random.split(key, 5)

    x = jax.random.normal(kx, (B, C, H, W), dtype=jnp.float32)
    # Deterministic synthetic parameters (Linear layer shapes from __init__).
    w1 = 0.1 * jax.random.normal(k1, (hidden, C), dtype=jnp.float32)   # Linear(C -> C//r)
    b1 = 0.1 * jax.random.normal(k2, (hidden,), dtype=jnp.float32)
    w2 = 0.1 * jax.random.normal(k3, (C, hidden), dtype=jnp.float32)   # Linear(C//r -> C)
    b2 = 0.1 * jax.random.normal(k4, (C,), dtype=jnp.float32)

    out = channel_gate(x, w1, b1, w2, b2)
    out = jax.block_until_ready(out)

    ref = channel_gate_ref(x, w1, b1, w2, b2)
    assert out.shape == (B, C, H, W)
    assert jnp.allclose(out, ref, atol=1e-5, rtol=1e-5), "mismatch vs reference"

    print("KERNEL_OK")
</pallas_src>

<mosaic_0001>
module attributes {stable_mosaic.version = 11 : i64} {
  func.func @channel_gate_kernel(%arg0: i32, %arg1: memref<1x32x256xf32, #tpu.memory_space<vmem>>, %arg2: memref<32x8xf32, #tpu.memory_space<vmem>>, %arg3: memref<1x8xf32, #tpu.memory_space<vmem>>, %arg4: memref<8x32xf32, #tpu.memory_space<vmem>>, %arg5: memref<1x32xf32, #tpu.memory_space<vmem>>, %arg6: memref<1x32x256xf32, #tpu.memory_space<vmem>>) attributes {dimension_semantics = [#tpu.dimension_semantics<parallel>], iteration_bounds = array<i64: 2>, scalar_prefetch = 0 : i64, scratch_operands = 0 : i64, tpu.core_type = #tpu.core_type<tc>, window_params = [{transform_indices = @transform_0, window_bounds = array<i64: 1, 32, 256>}, {pipeline_mode = #tpu.pipeline_mode<synchronous>, transform_indices = @transform_1, window_bounds = array<i64: 32, 8>}, {pipeline_mode = #tpu.pipeline_mode<synchronous>, transform_indices = @transform_2, window_bounds = array<i64: 1, 8>}, {pipeline_mode = #tpu.pipeline_mode<synchronous>, transform_indices = @transform_3, window_bounds = array<i64: 8, 32>}, {pipeline_mode = #tpu.pipeline_mode<synchronous>, transform_indices = @transform_4, window_bounds = array<i64: 1, 32>}, {transform_indices = @transform_5, window_bounds = array<i64: 1, 32, 256>}]} {
    %c0 = arith.constant 0 : index
    %c0_0 = arith.constant 0 : index
    %c0_1 = arith.constant 0 : index
    %0 = vector.load %arg1[%c0, %c0_0, %c0_1] : memref<1x32x256xf32, #tpu.memory_space<vmem>>, vector<1x32x256xf32>
    %cst = arith.constant dense<0.000000e+00> : vector<1x32xf32>
    %1 = vector.multi_reduction <add>, %0, %cst [2] : vector<1x32x256xf32> to vector<1x32xf32>
    %cst_2 = arith.constant dense<0xFF800000> : vector<1x32xf32>
    %2 = vector.multi_reduction <maximumf>, %0, %cst_2 [2] : vector<1x32x256xf32> to vector<1x32xf32>
    %cst_3 = arith.constant 3.906250e-03 : f32
    %3 = vector.broadcast %cst_3 : f32 to vector<1x32xf32>
    %4 = arith.mulf %1, %3 : vector<1x32xf32>
    %5 = tpu.concatenate %4, %2 in 0 : vector<1x32xf32>, vector<1x32xf32> -> vector<2x32xf32>
    %c0_4 = arith.constant 0 : index
    %c0_5 = arith.constant 0 : index
    %6 = vector.load %arg2[%c0_4, %c0_5] : memref<32x8xf32, #tpu.memory_space<vmem>>, vector<32x8xf32>
    %c0_6 = arith.constant 0 : index
    %c0_7 = arith.constant 0 : index
    %7 = vector.load %arg3[%c0_6, %c0_7] : memref<1x8xf32, #tpu.memory_space<vmem>>, vector<1x8xf32>
    %c0_8 = arith.constant 0 : index
    %c0_9 = arith.constant 0 : index
    %8 = vector.load %arg4[%c0_8, %c0_9] : memref<8x32xf32, #tpu.memory_space<vmem>>, vector<8x32xf32>
    %c0_10 = arith.constant 0 : index
    %c0_11 = arith.constant 0 : index
    %9 = vector.load %arg5[%c0_10, %c0_11] : memref<1x32xf32, #tpu.memory_space<vmem>>, vector<1x32xf32>
    %cst_12 = arith.constant dense<0.000000e+00> : vector<2x8xf32>
    %10 = tpu.matmul %5, %6, %cst_12 {dimension_numbers = #tpu.dot_dimension_numbers<[1], [0], [0], [1], [0, 0, 1, 1], [], []>} : vector<2x32xf32>, vector<32x8xf32>, vector<2x8xf32> -> vector<2x8xf32>
    %11 = vector.broadcast %7 : vector<1x8xf32> to vector<2x8xf32>
    %12 = arith.addf %10, %11 : vector<2x8xf32>
    %cst_13 = arith.constant 0.000000e+00 : f32
    %13 = vector.broadcast %cst_13 : f32 to vector<2x8xf32>
    %14 = arith.maximumf %12, %13 : vector<2x8xf32>
    %cst_14 = arith.constant dense<0.000000e+00> : vector<2x32xf32>
    %15 = tpu.matmul %14, %8, %cst_14 {dimension_numbers = #tpu.dot_dimension_numbers<[1], [0], [0], [1], [0, 0, 1, 1], [], []>} : vector<2x8xf32>, vector<8x32xf32>, vector<2x32xf32> -> vector<2x32xf32>
    %16 = vector.extract_strided_slice %15 {offsets = [0, 0], sizes = [1, 32], strides = [1, 1]} : vector<2x32xf32> to vector<1x32xf32>
    %17 = vector.extract_strided_slice %15 {offsets = [1, 0], sizes = [1, 32], strides = [1, 1]} : vector<2x32xf32> to vector<1x32xf32>
    %18 = arith.addf %16, %17 : vector<1x32xf32>
    %19 = arith.addf %18, %9 : vector<1x32xf32>
    %20 = arith.negf %19 : vector<1x32xf32>
    %21 = math.exp %20 : vector<1x32xf32>
    %cst_15 = arith.constant 1.000000e+00 : f32
    %22 = vector.broadcast %cst_15 : f32 to vector<1x32xf32>
    %23 = arith.addf %22, %21 : vector<1x32xf32>
    %24 = arith.divf %22, %23 : vector<1x32xf32>
    %25 = vector.shape_cast %24 : vector<1x32xf32> to vector<1x32x1xf32>
    %26 = vector.broadcast %25 : vector<1x32x1xf32> to vector<1x32x256xf32>
    %27 = arith.mulf %0, %26 : vector<1x32x256xf32>
    %c0_16 = arith.constant 0 : index
    %c0_17 = arith.constant 0 : index
    %c0_18 = arith.constant 0 : index
    %28 = vector.load %arg6[%c0_16, %c0_17, %c0_18] : memref<1x32x256xf32, #tpu.memory_space<vmem>>, vector<1x32x256xf32>
    tpu.vector_store %arg6[%c0_16, %c0_17, %c0_18], %27 {strides = array<i32>} : memref<1x32x256xf32, #tpu.memory_space<vmem>>, vector<1x32x256xf32>,
    return
  }
  func.func @transform_0(%arg0: i32) -> (i32, i32, i32) {
    %c0_i32 = arith.constant 0 : i32
    %c0_i32_0 = arith.constant 0 : i32
    %c0_i32_1 = arith.constant 0 : i32
    return %arg0, %c0_i32, %c0_i32_0 : i32, i32, i32
  }
  func.func @transform_1(%arg0: i32) -> (i32, i32) {
    %c0_i32 = arith.constant 0 : i32
    %c0_i32_0 = arith.constant 0 : i32
    %c0_i32_1 = arith.constant 0 : i32
    return %c0_i32, %c0_i32_0 : i32, i32
  }
  func.func @transform_2(%arg0: i32) -> (i32, i32) {
    %c0_i32 = arith.constant 0 : i32
    %c0_i32_0 = arith.constant 0 : i32
    %c0_i32_1 = arith.constant 0 : i32
    return %c0_i32, %c0_i32_0 : i32, i32
  }
  func.func @transform_3(%arg0: i32) -> (i32, i32) {
    %c0_i32 = arith.constant 0 : i32
    %c0_i32_0 = arith.constant 0 : i32
    %c0_i32_1 = arith.constant 0 : i32
    return %c0_i32, %c0_i32_0 : i32, i32
  }
  func.func @transform_4(%arg0: i32) -> (i32, i32) {
    %c0_i32 = arith.constant 0 : i32
    %c0_i32_0 = arith.constant 0 : i32
    %c0_i32_1 = arith.constant 0 : i32
    return %c0_i32, %c0_i32_0 : i32, i32
  }
  func.func @transform_5(%arg0: i32) -> (i32, i32, i32) {
    %c0_i32 = arith.constant 0 : i32
    %c0_i32_0 = arith.constant 0 : i32
    %c0_i32_1 = arith.constant 0 : i32
    return %arg0, %c0_i32, %c0_i32_0 : i32, i32, i32
  }
}

</mosaic_0001>

<bundles_post_ra>
// kernel: tpu_custom_call.1
= control target key start
LH: loop header
LB: loop body
LE: loop exit
PB: predicated region body
PF: predicated region fallthrough
CT: control target
= control target key end

     0   :  { %10 = vsyncpa [#allocation3], 0  ;;  %s1104_s0 = inlined_call_operand.hbm [shape: f32[2,32,256], index: 0, kind: input, shape index: {}]   ;;  %s1105_s1 = inlined_call_operand.vmem [shape: f32[32,8], index: 1, kind: input, shape index: {}]   ;;  %s1106_s2 = inlined_call_operand.vmem [shape: f32[1,8], index: 2, kind: input, shape index: {}]   ;;  %s1107_s3 = inlined_call_operand.vmem [shape: f32[8,32], index: 3, kind: input, shape index: {}]   ;;  %s1108_s4 = inlined_call_operand.vmem [shape: f32[1,32], index: 4, kind: input, shape index: {}]   ;;  %s1109_s5 = inlined_call_operand.hbm [shape: f32[2,32,256], index: 5, kind: output, shape index: {}]  }
   0x1   :  { %12 = vsyncpa [#allocation3 + $0x1], 0 }
   0x2   :  { %13 = vsyncpa [#allocation4], 0 }
   0x3   :  { %15 = vsyncpa [#allocation4 + $0x1], 0  ;;  %s875_s18 = smov 0   ;;  %s877_s19 = smov 0  }
   0x4   :  { %s879_s20 = smov 0   ;;  %s881_s21 = smov 0  }
   0x5 LB: > { %s896_s22 = sadd.s32 4294967295, %s834_s21   ;;  %s632_s23 = sadd.s32 4294967294, %s834_s21   ;;  %s834_s21 = sphi %s881_s21, %s1122_s21   ;;  %s830_s20 = sphi %s879_s20, %s1121_s20   ;;  %s826_s19 = sphi %s877_s19, %s1120_s19   ;;  %s822_s18 = sphi %s875_s18, %s1119_s18  }
   0x6   : > { %s900_s24 = sadd.s32 1, %s834_s21   ;;  %s28_s25 = sadd.s32 1, %s830_s20 }
   0x7   : > { %s25_s26 = ssub.s32 %s834_s21, %s900_s24  ;;  %p35_p0 = scmp.ne.s32.totalorder %s830_s20, %s826_s19 }
   0x8   : > { %p26_p1 = scmp.eq.s32.totalorder %s25_s26, 0  ;;  %p36_p2 = scmp.eq.s32.totalorder %s834_s21, 0 }
   0x9   : > { %p41_p3 = scmp.ne.s32.totalorder %s826_s19, %s822_s18  ;;  %p42_p4 = scmp.eq.s32.totalorder %s896_s22, 0 }
   0xa   : > { %s912_s27 = scalar_select %p26_p1, %s830_s20, %s28_s25  }
   0xb   : > { %p914_p5 = por %p36_p2, %p35_p0  ;;  %p918_p6 = por %p42_p4, %p41_p3 }
   0xc   : > { %p149_p7 = scmp.eq.s32.totalorder %s896_s22, 1  ;;  %p155_p8 = scmp.eq.s32.totalorder %s632_s23, 1 }
   0xd   : > { %p693_p10 = scmp.lt.s32.totalorder %s834_s21, 2  ;;  %s187_s7 = sand.u32 1, %s830_s20  }
   0xe   : > { %p925_p11 = por %p149_p7, %p35_p0  ;;  %p929_p12 = por %p155_p8, %p41_p3 }
   0xf   : > { %s650_s8 = sshll.u32 %s834_s21, 10  ;;  %s635_s9 = sshll.u32 %s187_s7, 6 }
  0x10   : > { %s1113_s30 = scalar_select %p925_p11, 1, 0 }
  0x11   : > { %s1114_s6 = scalar_select %p929_p12, 1, 0 }
  0x12   : > { %s938_s12 = scalar_lea.hbm %s1104_s0, %s650_s8  ;;  %s191_s13 = scalar_lea.vmem [#allocation2], %s635_s9 }
  0x13   : > { %s198_s14 = sshll.u32 %s191_s13, 4  ;;  %p942_p13 = pnand %p693_p10, %p914_p5  ;;  %s946_s14 = int_to_ptr.vmem [resolvable:$true] %s198_s14 }
  0x14   : > { %s948_s16 = scalar_lea.sflag [#allocation3], %s187_s7  ;;  %s738_s17 = scalar_lea.hbm %s938_s12, 1024 }
  0x15   : > { %p739_p0 = scmp.ne.s32.totalorder %s938_s12, %s738_s17  ;;  %p740_p1 = pneg %p942_p13 }
  0x16   : > { %s743_s26 = scalar_lea.hbm %s1104_s0, 2048  ;;  %p744_p4 = scmp.lt.u32.totalorder %s938_s12, %s1104_s0 }
  0x17   : > { %p741_p2 = pnand %p740_p1, %p739_p0  ;;  %p745_p5 = scmp.lt.u32.totalorder %s743_s26, %s738_s17 }
  0x18   : > { %p747_p8 = scmp.lt.u32.totalorder %s738_s17, %s938_s12 }
  0x19   : > { %p742_p3 = pneg %p741_p2  ;;  %p746_p7 = por %p745_p5, %p744_p4 }
  0x1b   : > { %p748_p10 = por %p747_p8, %p746_p7 }
  0x1d   : > { %p749_p9 = pnand %p748_p10, %p742_p3 }
  0x1f   : > { %752 = shalt.err (!%p749_p9)
}
  0x20   : > { %s753_s7 = scalar_lea.vmem %s946_s14, 1024  ;;  %s836_s9 = smov [#allocation2]  }
  0x21   : > { %p754_p0 = scmp.ne.s32.totalorder %s946_s14, %s753_s7  ;;  %s758_s10 = sshll.u32 %s836_s9, 4  ;;  %s759_s10 = int_to_ptr.vmem [resolvable:$false] %s758_s10 }
  0x22   : > { %s760_s11 = scalar_lea.vmem %s759_s10, 2048  ;;  %p761_p11 = scmp.lt.s32.totalorder %s946_s14, %s759_s10 }
  0x23   : > { %p756_p2 = pnand %p754_p0, %p740_p1  ;;  %p762_p4 = scmp.lt.s32.totalorder %s760_s11, %s753_s7 }
  0x25   : > { %p757_p12 = pneg %p756_p2  ;;  %p763_p5 = por %p762_p4, %p761_p11 }
  0x27   : > { %p764_p7 = pnand %p763_p5, %p757_p12 }
  0x29   : > { %767 = shalt.err (!%p764_p7)
}
  0x2a   : > { %s837_s13 = smov 256   ;;  %s838_s17 = smov 16  }
  0x2b   : > { %688 = dma.hbm_to_vmem [thread:$0]  (!%p942_p13), %s938_s12, 1024, %s946_s14, %s948_s16, %s837_s13, %s837_s13, %s838_s17  }
  0x2c   : > { %p638_p9 = scmp.ge.s32.totalorder %s834_s21, 1  ;;  %p206_p1 = scmp.lt.s32.totalorder %s834_s21, 3 }
  0x2e   : > { %p207_p3 = pnand %p638_p9, %p206_p1 }
  0x2f   : > { %s979_s23 = sand.u32 (!%p207_p3), 1, %s826_s19  }
  0x30   : > { %210 = sbr.rel (%p207_p3) target bundleno = 821 (0x335), region = 40  ;;  %s639_s25 = sshll.u32 (!%p207_p3), %s979_s23, 6 }
  0x31   : > { %s213_s26 = scalar_lea.sflag (!%p207_p3), [#allocation3], %s979_s23  ;;  %s216_s28 = scalar_lea.vmem (!%p207_p3), [#allocation2], %s639_s25 }
  0x37   : > { %813 = dma.done.wait (%p918_p6), %s213_s26, 1024  }
  0x38   : > { %815 = vsyncadd (%p918_p6), %s213_s26, 4294966272  ;;  %v989_v0 = vld [vmem:[%s216_s28 + $0x20] sm:$0xff]  ;;  %v991_v1 = vld [vmem:[%s216_s28 + $0x28] sm:$0xff]  ;;  %v839_v19 = vmov 0.0|0.0   ;;  %vm840_vm0 = vmmov 0   ;;  %v841_v23 = vmov 0.0   ;;  %v283_v24 = vlaneseq }
  0x39   : > { %v993_v2 = vld [vmem:[%s216_s28] sm:$0xff]  ;;  %v257_v3 = vadd.f32 %v991_v1, %v989_v0  ;;  %v997_v4 = vld [vmem:[%s216_s28 + $0x8] sm:$0xff]  ;;  %v999_v5 = vld [vmem:[%s216_s28 + $0x30] sm:$0xff]  ;;  %v269_v15 = vmax.f32 %v989_v0, %v991_v1  ;;  %675 = vmatprep.subr.bf16.mxu0 %v839_v19  ;;  %667 = vmatprep.mubr.msk.f32.mxu0 %vm840_vm0, %v841_v23  ;;  %vm294_vm1 = vcmask 130112   ;;  %vm301_vm2 = vcmask 195712   ;;  %s242_s29 = scalar_lea.vmem [#allocation5], %s639_s25 }
  0x3a   : > { %v1001_v6 = vld [vmem:[%s216_s28 + $0x38] sm:$0xff]  ;;  %v251_v7 = vadd.f32 %v997_v4, %v993_v2  ;;  %v1005_v8 = vld [vmem:[%s216_s28 + $0x10] sm:$0xff]  ;;  %v263_v13 = vmax.f32 %v993_v2, %v997_v4  ;;  %v337_v16 = vld [vmem:[%s1105_s1] sm:$0xff]  ;;  %670 = vmatprep.subr.mxu1 %v841_v23  ;;  %672 = vmatprep.mubr.msk.f32.mxu1 %vm840_vm0, %v841_v23  ;;  %v284_v25 = vand.u32 127, %v283_v24  ;;  %v286_v28 = vshrl.u32 %v283_v24, 7  ;;  %s559_s12 = sshll.u32 %s242_s29, 4  ;;  %s1053_s12 = int_to_ptr.vmem [resolvable:$true] %s559_s12 }
  0x3b   : > { %v1007_v9 = vld [vmem:[%s216_s28 + $0x18] sm:$0xff]  ;;  %258 = vadd.xlane.f32.xlu1 %v257_v3  ;;  %v260_v10 = vadd.f32 %v1001_v6, %v999_v5  ;;  %v272_v14 = vmax.f32 %v999_v5, %v1001_v6  ;;  %v338_v17 = vld [vmem:[%s1105_s1 + $0x8] sm:$0xff]  ;;  %v339_v20 = vld [vmem:[%s1105_s1 + $0x10] sm:$0xff]  ;;  %vm308_vm3 = vcmask 261312   ;;  %vm335_vm4 = vcmask 1040384   ;;  %s651_s14 = sshll.u32 %s896_s22, 10 }
  0x3c   : > { %252 = vadd.xlane.f32.xlu0 %v251_v7  ;;  %v254_v11 = vadd.f32 %v1007_v9, %v1005_v8  ;;  %v266_v12 = vmax.f32 %v1005_v8, %v1007_v9  ;;  %v676_v18 = vpack.c.bf16 %v338_v17, %v337_v16  ;;  %v340_v21 = vld [vmem:[%s1105_s1 + $0x18] sm:$0xff]  ;;  %v289_v27 = vadd.s32 4294967288, %v284_v25  ;;  %v342_v61 = vld [vmem:[%s1107_s3] sm:$0xff]  ;;  %s1058_s16 = scalar_lea.hbm %s1109_s5, %s651_s14  ;;  %s546_s22 = scalar_lea.sflag [#allocation4], %s979_s23 }
  0x3d   : > { %v679_v22 = vpack.c.bf16 %v340_v21, %v339_v20  ;;  %v296_v30 = vadd.s32 4294967280, %v284_v25  ;;  %v287_v33 = vsub.s32 %v284_v25, %v286_v28  ;;  %v303_v35 = vadd.s32 4294967272, %v284_v25  ;;  %671 = vmatpush3.msra.mxu1 %v342_v61  ;;  %v641_v62 = vld [vmem:[%s1106_s2] ss:$0 sm:$0xff]  ;;  %s768_s8 = scalar_lea.vmem %s1053_s12, 1024  ;;  %p1116_p11 = scmp.ne.s32.totalorder %s1113_s30, 0 }
  0x3e   : > { %677 = vmatpush3.bf16.msra.mxu0 %v676_v18  ;;  %v292_v32 = vsub.s32 %v289_v27, %v286_v28  ;;  %vm350_vm5 = vcmask 261120   ;;  %vm425_vm6 = vcmask 64512   ;;  %v512_v20 = vsub.s32 0, %v286_v28  ;;  %p769_p6 = scmp.ne.s32.totalorder %s1053_s12, %s768_s8  ;;  %s842_s7 = smov [#allocation5]  }
  0x3f   : > { %261 = vadd.xlane.f32.xlu1 %v260_v10  ;;  %678 = vmatprep.subr.bf16.mxu0 %v839_v19  ;;  %v299_v38 = vsub.s32 %v296_v30, %v286_v28  ;;  %v306_v43 = vsub.s32 %v303_v35, %v286_v28  ;;  %s772_s9 = sshll.u32 %s842_s7, 4  ;;  %s773_s9 = int_to_ptr.vmem [resolvable:$false] %s772_s9 }
  0x40   : > { %255 = vadd.xlane.f32.xlu0 %v254_v11  ;;  %p770_p12 = pnand %p769_p6, %p1116_p11  ;;  %s774_s10 = scalar_lea.vmem %s773_s9, 2048 }
  0x41   : > { %p775_p8 = scmp.lt.s32.totalorder %s1053_s12, %s773_s9  ;;  %p776_p10 = scmp.lt.s32.totalorder %s774_s10, %s768_s8 }
  0x42   : > { %680 = vmatpush3.bf16.msra.mxu0 %v679_v22  ;;  %p771_p13 = pneg %p770_p12 }
  0x43   : > { %267 = vmax.xlane.f32.xlu1 %v266_v12  ;;  %p777_p0 = por %p776_p10, %p775_p8 }
  0x44   : > { %264 = vmax.xlane.f32.xlu0 %v263_v13 }
  0x45   : > { %p778_p2 = pnand %p777_p0, %p771_p13 }
  0x47   : > { %273 = vmax.xlane.f32.xlu1 %v272_v14  ;;  %v343_v14 = vld [vmem:[%s1108_s4] sm:$0x1] }
  0x48   : > { %270 = vmax.xlane.f32.xlu0 %v269_v15 }
  0xc8   : > { %v259_v26 = vpop.xlane.xlu1 %258 }
  0xc9   : > { %v253_v29 = vpop.xlane.xlu0 %252  ;;  %v277_v39 = vmul.f32 0.00390625, %v259_v26 }
  0xca   : > { %v275_v34 = vmul.f32 0.00390625, %v253_v29 }
  0xcb   : > { %v300_v49 = vrot.slane %v277_v39, %v299_v38 }
  0xcc   : > { %v262_v31 = vpop.xlane.xlu1 %261  ;;  %v288_v42 = vrot.slane %v275_v34, %v287_v33 }
  0xcd   : > { %v256_v36 = vpop.xlane.xlu0 %255  ;;  %v278_v44 = vmul.f32 0.00390625, %v262_v31 }
  0xce   : > { %v276_v37 = vmul.f32 0.00390625, %v256_v36 }
  0xcf   : > { %v307_v51 = vrot.slane %v278_v44, %v306_v43 }
  0xd0   : > { %v293_v40 = vrot.slane %v276_v37, %v292_v32  ;;  %v268_v41 = vpop.xlane.xlu1 %267 }
  0xd1   : > { %v265_v45 = vpop.xlane.xlu0 %264  ;;  %v322_v47 = vrot.slane %v268_v41, %v292_v32 }
  0xd2   : > { %v295_v46 = vsel %vm294_vm1, %v293_v40, %v288_v42  ;;  %v318_v48 = vrot.slane %v265_v45, %v287_v33 }
  0xd3   : > { %v302_v55 = vsel %vm301_vm2, %v300_v49, %v295_v46 }
  0xd4   : > { %v274_v50 = vpop.xlane.xlu1 %273  ;;  %v323_v56 = vsel %vm294_vm1, %v322_v47, %v318_v48  ;;  %v309_v59 = vsel %vm308_vm3, %v307_v51, %v302_v55 }
  0xd5   : > { %v271_v52 = vpop.xlane.xlu0 %270  ;;  %v332_v53 = vrot.slane %v274_v50, %v306_v43 }
  0xd6   : > { %v327_v54 = vrot.slane %v271_v52, %v299_v38 }
  0xd8   : > { %v328_v57 = vsel %vm301_vm2, %v327_v54, %v323_v56 }
  0xd9   : > { %v333_v58 = vsel %vm308_vm3, %v332_v53, %v328_v57 }
  0xda   : > { %v336_v60 = vsel %vm335_vm4, %v309_v59, %v333_v58 }
  0xdb   : > { %668 = vmatmul.mubr.msk.f32.vlgmr.msra.gmra.mrb[0].mxu0 %vm350_vm5, %v336_v60 }
 0x1ae   : > { %v420_v63 = vpop.f32.mrb[0].mxu0 }
 0x1af   : > { %v421_v3 = vadd.f32 %v641_v62, %v420_v63  ;;  %v669_v7 = vpop.f32.mrb[1].mxu0 }
 0x1b1   : > { %v424_v10 = vmax.f32 %v421_v3, 0.0 }
 0x1b3   : > { %673 = vmatmul.mubr.msk.f32.vlgmr.msra.gmra.mrb[0].mxu1 %vm425_vm6, %v424_v10 }
 0x286   : > { %v495_v11 = vpop.f32.mrb[0].mxu1 }
 0x287   : > { %v500_v12 = vrot.slane %v495_v11, 1  ;;  %v674_v13 = vpop.f32.mrb[1].mxu1 }
 0x289   : > { %v502_v15 = vadd.f32 %v500_v12, %v495_v11 }
 0x28b   : > { %v503_v16 = vadd.f32 %v502_v15, %v343_v14 }
 0x28d   : > { %v644_v17 = vmul.f32 -1.442695, %v503_v16 }
 0x28f   : > { %734 = vpow2.f32 %v644_v17 }
 0x299   : > { %v735_v18 = vpop.eup %734 }
 0x29a   : > { %v507_v19 = vadd.f32 1.0, %v735_v18 }
 0x29c   : > { %736 = vrcp.f32 %v507_v19 }
 0x2a6   : > { %v737_v21 = vpop.eup %736 }
 0x2a7   : > { %v513_v22 = vrot.slane %v737_v21, %v512_v20 }
 0x2a9   : > { %519 = vbcast.lane.b32.xlu1 %v513_v22, 264  ;;  %515 = vbcast.lane.b32.xlu0 %v513_v22, 256 }
 0x2ad   : > { %523 = vbcast.lane.b32.xlu1 %v513_v22, 272 }
 0x2b1   : > { %527 = vbcast.lane.b32.xlu1 %v513_v22, 280 }
 0x31b   : > { %v520_v23 = vpop.permute.xlu1 %519  ;;  %v516_v24 = vpop.permute.xlu0 %515 }
 0x31c   : > { %v531_v25 = vmul.f32 %v520_v23, %v1005_v8  ;;  %v532_v26 = vmul.f32 %v520_v23, %v1007_v9  ;;  %v529_v27 = vmul.f32 %v516_v24, %v993_v2  ;;  %v530_v29 = vmul.f32 %v516_v24, %v997_v4 }
 0x31e   : > { %539 = vst [vmem:[%s242_s29 + $0x10] sm:$0xff] %v531_v25  ;;  %540 = vst [vmem:[%s242_s29 + $0x18] sm:$0xff] %v532_v26 }
 0x31f   : > { %537 = vst [vmem:[%s242_s29] sm:$0xff] %v529_v27  ;;  %538 = vst [vmem:[%s242_s29 + $0x8] sm:$0xff] %v530_v29  ;;  %v524_v28 = vpop.permute.xlu1 %523 }
 0x320   : > { %v533_v30 = vmul.f32 %v524_v28, %v989_v0  ;;  %v534_v8 = vmul.f32 %v524_v28, %v991_v1 }
 0x322   : > { %541 = vst [vmem:[%s242_s29 + $0x20] sm:$0xff] %v533_v30  ;;  %542 = vst [vmem:[%s242_s29 + $0x28] sm:$0xff] %v534_v8 }
 0x323   : > { %v528_v2 = vpop.permute.xlu1 %527 }
 0x324   : > { %v535_v4 = vmul.f32 %v528_v2, %v999_v5  ;;  %v536_v0 = vmul.f32 %v528_v2, %v1001_v6 }
 0x326   : > { %543 = vst [vmem:[%s242_s29 + $0x30] sm:$0xff] %v535_v4  ;;  %544 = vst [vmem:[%s242_s29 + $0x38] sm:$0xff] %v536_v0 }
 0x327   : > { %781 = shalt.err (!%p778_p2)
}
 0x328   : > { %s782_s11 = scalar_lea.hbm %s1058_s16, 1024  ;;  %s786_s26 = scalar_lea.hbm %s1109_s5, 2048 }
 0x329   : > { %p783_p4 = scmp.ne.s32.totalorder %s1058_s16, %s782_s11  ;;  %p787_p9 = scmp.lt.u32.totalorder %s1058_s16, %s1109_s5 }
 0x32a   : > { %p788_p1 = scmp.lt.u32.totalorder %s786_s26, %s782_s11  ;;  %p790_p6 = scmp.lt.u32.totalorder %s782_s11, %s1058_s16 }
 0x32b   : > { %p784_p5 = pnand %p783_p4, %p1116_p11 }
 0x32c   : > { %p789_p3 = por %p788_p1, %p787_p9 }
 0x32d   : > { %p785_p7 = pneg %p784_p5 }
 0x32e   : > { %p791_p12 = por %p790_p6, %p789_p3 }
 0x330   : > { %p792_p13 = pnand %p791_p12, %p785_p7 }
 0x332   : > { %795 = shalt.err (!%p792_p13)
}
 0x333   : > { %s843_s14 = smov 256   ;;  %s844_s25 = smov 16  }
 0x334   : > { %683 = dma.vmem_to_hbm [thread:$0]  (%p1116_p11), %s1053_s12, 1024, %s1058_s16, %s546_s22, %s843_s14, %s843_s14, %s844_s25  }
 0x335 PF: > { %s574_s15 = sand.u32 1, %s822_s18   ;;  %p1117_p8 = scmp.ne.s32.totalorder %s1114_s6, 0 }
 0x336   : > { %p1118_p10 = scmp.ge.s32.totalorder %s834_s21, 2  ;;  %s575_s8 = scalar_lea.sflag [#allocation4], %s574_s15 }
 0x338   : > { %p690_p0 = pnand %p1118_p10, %p1117_p8 }
 0x33a   : > { %817 = dma.done.wait (!%p690_p0), %s575_s8, 1024  }
 0x33b   : > { %819 = vsyncadd (!%p690_p0), %s575_s8, 4294966272  ;;  %p18_p2 = scmp.ge.s32.totalorder %s900_s24, 4   ;;  %s1119_s18 = smov %s826_s19 }
 0x33c   : > { %s1120_s19 = smov %s830_s20  ;;  %s1121_s20 = smov %s912_s27 }
 0x33d   : > { %s1122_s21 = smov %s900_s24  ;;  %20 = sbr.rel (!%p18_p2) target bundleno = 5 (0x5), region = 85 }
 0x344   :  { %580 = vsyncpa [#allocation3], 1 }
 0x345   :  { %582 = vsyncpa [#allocation3 + $0x1], 1 }
 0x346   :  { %583 = vsyncpa [#allocation4], 1 }
 0x347   :  { %585 = vsyncpa [#allocation4 + $0x1], 1 }

</bundles_post_ra>
